<compile_context>
chip_gen: v7x
topology: tpu7x:2x2x1
jax: 0.10.0
libtpu: 0.0.40
codegen_flags: <defaults>
</compile_context>

<pallas_src>
from functools import partial

import jax
import jax.numpy as jnp
from jax.experimental import pallas as pl
from jax.experimental.pallas import tpu as pltpu

VMEM = pl.BlockSpec(memory_space=pltpu.MemorySpace.VMEM)
MATMUL_DTYPE = jnp.bfloat16   # MXU operand dtype; accumulation stays float32.


def _rep(shape):
    """Full-array BlockSpec under a 1-D (batch) grid: same block every step."""
    n = len(shape)
    return pl.BlockSpec(shape, lambda b: (0,) * n)


# ----------------------------- in-kernel helpers -----------------------------

def _mm(x, w):
    """bf16-operand matmul with f32 accumulation (MXU-friendly)."""
    return jnp.dot(x.astype(MATMUL_DTYPE), w.astype(MATMUL_DTYPE),
                   preferred_element_type=jnp.float32)


def _gelu(y):
    # TODO(synk): PyTorch nn.GELU() default is the exact erf form; tanh approximation
    # is used here (erf has no guaranteed Mosaic lowering).
    c = 0.7978845608028654  # sqrt(2/pi)
    return 0.5 * y * (1.0 + jnp.tanh(c * (y + 0.044715 * y * y * y)))


def _ln(x, g, b, eps):
    mu = jnp.mean(x, axis=-1, keepdims=True)
    xc = x - mu
    var = jnp.mean(xc * xc, axis=-1, keepdims=True)
    return xc * jax.lax.rsqrt(var + eps) * g + b


def _mha(qkv, heads, scale):
    """qkv: (N, 3C) for one batch element -> (N, C); all heads inside one kernel."""
    n, c3 = qkv.shape
    c = c3 // 3
    d = c // heads
    outs = []
    for h in range(heads):
        q = qkv[:, h * d:(h + 1) * d].astype(MATMUL_DTYPE)
        k = qkv[:, c + h * d:c + (h + 1) * d].astype(MATMUL_DTYPE)
        v = qkv[:, 2 * c + h * d:2 * c + (h + 1) * d].astype(MATMUL_DTYPE)
        s = jax.lax.dot_general(q, k, (((1,), (1,)), ((), ())),
                                preferred_element_type=jnp.float32) * scale
        s = s - jnp.max(s, axis=-1, keepdims=True)
        p = jnp.exp(s)
        # EUP reciprocal instead of a VALU divide.
        p = p * pl.reciprocal(jnp.sum(p, axis=-1, keepdims=True), approx=True)
        outs.append(jnp.dot(p.astype(MATMUL_DTYPE), v,
                            preferred_element_type=jnp.float32))
    return jnp.concatenate(outs, axis=-1)


# ----------------------------- Pallas kernels -----------------------------

def _linear_kernel(x_ref, w_ref, b_ref, o_ref, *, act):
    y = _mm(x_ref[...], w_ref[...]) + b_ref[...]
    if act == "gelu":
        y = _gelu(y)
    o_ref[...] = y.astype(o_ref.dtype)


def _block_kernel(x_ref, g1_ref, b1_ref, wqkv_ref, bqkv_ref, wproj_ref, bproj_ref,
                  g2_ref, b2_ref, wfc1_ref, bfc1_ref, wfc2_ref, bfc2_ref, o_ref,
                  *, heads, scale, eps):
    """Fused transformer Block for one batch element (grid over batch)."""
    x = x_ref[0].astype(jnp.float32)                                   # (N, C)
    xn = _ln(x, g1_ref[...], b1_ref[...], eps)
    qkv = _mm(xn, wqkv_ref[...]) + bqkv_ref[...]                       # (N, 3C)
    att = _mha(qkv, heads, scale)                                      # (N, C)
    x1 = x + _mm(att, wproj_ref[...]) + bproj_ref[...]                 # residual 1
    xn2 = _ln(x1, g2_ref[...], b2_ref[...], eps)
    h = _gelu(_mm(xn2, wfc1_ref[...]) + bfc1_ref[...])
    y = _mm(h, wfc2_ref[...]) + bfc2_ref[...]
    o_ref[0] = (x1 + y).astype(o_ref.dtype)                            # residual 2


def _block2_kernel(x_ref, g1_ref, b1_ref, wqkv_ref, bqkv_ref, wproj_ref, bproj_ref,
                   g2_ref, b2_ref, wfc1c_ref, bfc1c_ref, wfc2a_ref, bfc2a_ref,
                   wfc2b_ref, bfc2b_ref, o1_ref, o2_ref,
                   *, heads, scale, eps, hidden):
    """Fused Block2: dual-MLP branches share one concatenated fc1 matmul."""
    x = x_ref[0].astype(jnp.float32)
    xn = _ln(x, g1_ref[...], b1_ref[...], eps)
    qkv = _mm(xn, wqkv_ref[...]) + bqkv_ref[...]
    att = _mha(qkv, heads, scale)
    x1 = x + _mm(att, wproj_ref[...]) + bproj_ref[...]
    xn2 = _ln(x1, g2_ref[...], b2_ref[...], eps)
    h = _gelu(_mm(xn2, wfc1c_ref[...]) + bfc1c_ref[...])               # (N, 2*hidden)
    y1 = _mm(h[:, :hidden], wfc2a_ref[...]) + bfc2a_ref[...]
    y2 = _mm(h[:, hidden:], wfc2b_ref[...]) + bfc2b_ref[...]
    o1_ref[0] = (x1 + y1).astype(o1_ref.dtype)
    o2_ref[0] = (x1 + y2).astype(o2_ref.dtype)


def _fc_inter_kernel(x_ref, w00_ref, b00_ref, w01_ref, b01_ref,
                     w10_ref, b10_ref, w11_ref, b11_ref, o_ref, *, c):
    """fc_inter for one batch element; channel weights stored (num_new, num_old),
    biases (num_new, 1) so no transposes are needed."""
    x = x_ref[0].astype(jnp.float32)                                   # (N_old, D_old)
    ws = [(w00_ref, b00_ref), (w01_ref, b01_ref), (w10_ref, b10_ref), (w11_ref, b11_ref)]
    # NOTE: matches the reference: chunks 2 and 3 reuse channel0_* / channel1_* weights.
    plan = [(0, 0, 1), (1, 2, 3), (2, 0, 1), (3, 2, 3)]
    segs = []
    for k, i0, i1 in plan:
        xc = x[:, k * c:(k + 1) * c].astype(MATMUL_DTYPE)              # (N_old, c)
        for wi in (i0, i1):
            w, b = ws[wi]
            y = jnp.dot(w[...].astype(MATMUL_DTYPE), xc,
                        preferred_element_type=jnp.float32)            # (N_new, c)
            segs.append(_gelu(y + b[...]))
    o_ref[0] = jnp.concatenate(segs, axis=-1).astype(o_ref.dtype)      # (N_new, 2*D_old)


def _ln_head_kernel(x_ref, g_ref, b_ref, w_ref, bh_ref, o_ref, *, eps):
    x = x_ref[...].astype(jnp.float32)
    xn = _ln(x, g_ref[...], b_ref[...], eps)
    o_ref[...] = (_mm(xn, w_ref[...]) + bh_ref[...]).astype(o_ref.dtype)


# ----------------------------- kernel wrappers -----------------------------

def linear(x, p, act=None, *, tm=256, tn=512):
    """y = x @ w + b (optional GELU) over the last axis of x, M/N-tiled."""
    shp = x.shape
    x2 = x.reshape(-1, shp[-1])
    M, K = x2.shape
    N = p["w"].shape[1]
    tm_eff = min(tm, M)
    tn_eff = min(tn, N)
    grid = (pl.cdiv(M, tm_eff), pl.cdiv(N, tn_eff))
    out = pl.pallas_call(
        partial(_linear_kernel, act=act),
        grid=grid,
        in_specs=[pl.BlockSpec((tm_eff, K), lambda i, j: (i, 0)),
                  pl.BlockSpec((K, tn_eff), lambda i, j: (0, j)),
                  pl.BlockSpec((1, tn_eff), lambda i, j: (0, j))],
        out_specs=pl.BlockSpec((tm_eff, tn_eff), lambda i, j: (i, j)),
        out_shape=jax.ShapeDtypeStruct((M, N), x2.dtype),
        compiler_params=pltpu.CompilerParams(
            dimension_semantics=("parallel", "parallel")),
    )(x2, p["w"], p["b"])
    return out.reshape(shp[:-1] + (N,))


def block_forward(x, p, heads, ln_eps=1e-5):
    B, N, C = x.shape
    d = C // heads
    scale = d ** (-0.5)
    xspec = pl.BlockSpec((1, N, C), lambda b: (b, 0, 0))
    ins = [x,
           p["norm1"]["g"], p["norm1"]["b"],
           p["qkv"]["w"], p["qkv"]["b"],
           p["proj"]["w"], p["proj"]["b"],
           p["norm2"]["g"], p["norm2"]["b"],
           p["fc1"]["w"], p["fc1"]["b"],
           p["fc2"]["w"], p["fc2"]["b"]]
    return pl.pallas_call(
        partial(_block_kernel, heads=heads, scale=scale, eps=ln_eps),
        grid=(B,),
        in_specs=[xspec] + [_rep(a.shape) for a in ins[1:]],
        out_specs=xspec,
        out_shape=jax.ShapeDtypeStruct((B, N, C), x.dtype),
        compiler_params=pltpu.CompilerParams(dimension_semantics=("parallel",)),
    )(*ins)


def block2_forward(x, p, heads, ln_eps=1e-5):
    B, N, C = x.shape
    d = C // heads
    scale = d ** (-0.5)
    hidden = p["fc2"]["w"].shape[0]
    xspec = pl.BlockSpec((1, N, C), lambda b: (b, 0, 0))
    ins = [x,
           p["norm1"]["g"], p["norm1"]["b"],
           p["qkv"]["w"], p["qkv"]["b"],
           p["proj"]["w"], p["proj"]["b"],
           p["norm2"]["g"], p["norm2"]["b"],
           p["fc1c"]["w"], p["fc1c"]["b"],
           p["fc2"]["w"], p["fc2"]["b"],
           p["fc2_2"]["w"], p["fc2_2"]["b"]]
    out_sh = jax.ShapeDtypeStruct((B, N, C), x.dtype)
    x1, x2 = pl.pallas_call(
        partial(_block2_kernel, heads=heads, scale=scale, eps=ln_eps, hidden=hidden),
        grid=(B,),
        in_specs=[xspec] + [_rep(a.shape) for a in ins[1:]],
        out_specs=(xspec, xspec),
        out_shape=(out_sh, out_sh),
        compiler_params=pltpu.CompilerParams(dimension_semantics=("parallel",)),
    )(*ins)
    return x1, x2


def fc_inter_forward(x, cls_token, p):
    B, Nold, Dold = x.shape
    c = Dold // 4
    Nnew = p["ch0_0"]["w"].shape[0]
    xspec = pl.BlockSpec((1, Nold, Dold), lambda b: (b, 0, 0))
    ins = [x]
    for k in ("ch0_0", "ch0_1", "ch1_0", "ch1_1"):
        ins += [p[k]["w"], p[k]["b"]]
    y = pl.pallas_call(
        partial(_fc_inter_kernel, c=c),
        grid=(B,),
        in_specs=[xspec] + [_rep(a.shape) for a in ins[1:]],
        out_specs=pl.BlockSpec((1, Nnew, 2 * Dold), lambda b: (b, 0, 0)),
        out_shape=jax.ShapeDtypeStruct((B, Nnew, 2 * Dold), x.dtype),
        compiler_params=pltpu.CompilerParams(dimension_semantics=("parallel",)),
    )(*ins)
    if cls_token is not None:
        cls_token = linear(cls_token, p["fc"])
        return y, cls_token
    return y


def ln_head(cls2, p_norm, p_head, eps=1e-6):
    B, _ = cls2.shape
    N = p_head["w"].shape[1]
    return pl.pallas_call(
        partial(_ln_head_kernel, eps=eps),
        out_shape=jax.ShapeDtypeStruct((B, N), cls2.dtype),
        in_specs=[VMEM] * 5,
        out_specs=VMEM,
    )(cls2, p_norm["g"], p_norm["b"], p_head["w"], p_head["b"])


# ----------------------------- model modules -----------------------------

def transformer_forward(x, cls_tokens, tparams, heads, inter_start, stage_ids):
    token_length = cls_tokens.shape[1]
    x = jnp.concatenate([cls_tokens, x], axis=1)
    counter = 0
    info_list = []
    x_0 = x_00 = x_01 = None
    for bp, btype in zip(tparams["blocks"], tparams["types"]):
        if counter in stage_ids:
            info_list.append(x)
        if inter_start is not None and inter_start == counter:
            x_0 = x
            x_00, x_01 = block2_forward(x, bp, heads)
            x = x_00
            counter += 1
            break
        x = block_forward(x, bp, heads)
        counter += 1
    if counter in stage_ids:
        info_list.append(x)
    cls_tokens = x[:, :token_length]
    x = x[:, token_length:]
    if inter_start is not None:
        return x, cls_tokens, x_0, x_00, x_01, info_list
    return x, cls_tokens, info_list


def patch_embed_forward(x_nchw, p, patch):
    B, C, H, W = x_nchw.shape
    h, w = H // patch, W // patch
    xp = x_nchw.reshape(B, C, h, patch, w, patch)
    xp = xp.transpose(0, 2, 4, 1, 3, 5).reshape(B * h * w, C * patch * patch)
    y = linear(xp, p)                                          # Pallas matmul + bias
    return y.reshape(B, h * w, -1)                             # (B, N, C_out)


def sufvit_forward(params, x, cfg):
    x = patch_embed_forward(x, params["patch_embed"], cfg["patch_size"])
    x = x + params["pos_embed"]                                # pos stored as (1, N, C)
    B = x.shape[0]
    cls_tokens = jnp.broadcast_to(params["cls_token"],
                                  (B, 1, params["cls_token"].shape[-1]))

    x_start_list, x_0_list, x_1_list, info_list = [], [], [], []
    n_stages = len(cfg["change_layer_list"])
    for stage in range(n_stages - 1):
        tp = params["transformers"][stage]
        x, cls_tokens, x_start, x_0, x_1, info = transformer_forward(
            x, cls_tokens, tp, cfg["head_list"][stage],
            cfg["change_layer_list"][stage], cfg["stage_list"][stage])
        x_0, cls_tokens = fc_inter_forward(x_0, cls_tokens, params["pools"][stage])
        x_1 = fc_inter_forward(x_1, None, params["inters"][stage])
        x_start_list.append(x_start)
        x_0_list.append(x_0)
        x_1_list.append(x_1)
        x = x_0
        info_list.extend(info)

    tp = params["transformers"][-1]
    x, cls_tokens, info = transformer_forward(
        x, cls_tokens, tp, cfg["head_list"][-1], None, cfg["stage_list"][2])
    info_list.extend(info)

    logits = ln_head(cls_tokens[:, 0], params["norm"], params["head"], eps=1e-6)
    return logits, x_start_list, x_0_list, x_1_list, info_list


# ----------------------------- parameter init -----------------------------

def init_params(key, cfg):
    kit = iter(jax.random.split(key, 512))
    nk = lambda: next(kit)

    def dense(in_dim, out_dim, bias=True):
        w = jax.random.normal(nk(), (in_dim, out_dim), jnp.float32) * 0.02
        if bias:
            b = jax.random.normal(nk(), (1, out_dim), jnp.float32) * 1e-6
        else:
            b = jnp.zeros((1, out_dim), jnp.float32)
        return {"w": w, "b": b}

    def dense_t(in_dim, out_dim):
        # PyTorch-layout weight (out, in) and bias (out, 1) for fc_inter channel FCs.
        w = jax.random.normal(nk(), (out_dim, in_dim), jnp.float32) * 0.02
        b = jax.random.normal(nk(), (out_dim, 1), jnp.float32) * 1e-6
        return {"w": w, "b": b}

    def lnp(dim):
        return {"g": jnp.ones((1, dim), jnp.float32),
                "b": jnp.zeros((1, dim), jnp.float32)}

    def block_p(dim, mlp_ratio, qkv_bias, two_mlp):
        hidden = int(dim * mlp_ratio)
        p = {"norm1": lnp(dim),
             "qkv": dense(dim, dim * 3, bias=qkv_bias),
             "proj": dense(dim, dim),
             "norm2": lnp(dim)}
        if two_mlp:
            fc1 = dense(dim, hidden)
            fc1_2 = dense(dim, hidden)
            # Concatenated fc1 -> single wide matmul (lane-dense output) in-kernel.
            p["fc1c"] = {"w": jnp.concatenate([fc1["w"], fc1_2["w"]], axis=1),
                         "b": jnp.concatenate([fc1["b"], fc1_2["b"]], axis=1)}
            p["fc2"] = dense(hidden, dim)
            p["fc2_2"] = dense(hidden, dim)
        else:
            p["fc1"] = dense(dim, hidden)
            p["fc2"] = dense(hidden, dim)
        return p

    embed0 = cfg["base_dims"][0] * cfg["head_list"][0]
    pp = cfg["patch_size"]
    params = {}
    params["patch_embed"] = dense(cfg["in_chans"] * pp * pp, embed0)
    # pos_embed stored directly in token layout (1, N, C).
    params["pos_embed"] = jax.random.normal(
        nk(), (1, cfg["token_num_list"][0], embed0), jnp.float32) * 0.02
    params["cls_token"] = jax.random.normal(nk(), (1, 1, embed0), jnp.float32) * 0.02

    params["transformers"] = []
    for stage in range(len(cfg["depth_list"])):
        dim = cfg["base_dims"][stage] * cfg["head_list"][stage]
        cl = cfg["change_layer_list"][stage]
        blocks, types = [], []
        for i in range(cfg["depth_list"][stage]):
            if cl is not None and i == cl:
                blocks.append(block_p(dim, cfg["mlp_ratio"], False, True))
                types.append("block2")
            else:
                blocks.append(block_p(dim, cfg["mlp_ratio"], True, False))
                types.append("block")
        params["transformers"].append({"blocks": blocks, "types": types})

    params["pools"], params["inters"] = [], []
    for stage in range(len(cfg["head_list"]) - 1):
        num_old = cfg["inter_layer_num"][stage][0] + 1
        d_old, d_new = cfg["inter_layer_dim"][stage]

        def fc_inter_p(num_new):
            return {"ch0_0": dense_t(num_old, num_new),
                    "ch0_1": dense_t(num_old, num_new),
                    "ch1_0": dense_t(num_old, num_new),
                    "ch1_1": dense_t(num_old, num_new),
                    "fc": dense(d_old, d_new)}

        params["pools"].append(fc_inter_p(cfg["inter_layer_num"][stage][1]))
        params["inters"].append(fc_inter_p(cfg["inter_layer_num"][stage][2]))

    dim_last = cfg["base_dims"][-1] * cfg["head_list"][-1]
    params["norm"] = lnp(dim_last)
    params["head"] = dense(dim_last, cfg["num_classes"])
    return params


# ----------------------------- main -----------------------------

if __name__ == "__main__":
    cfg = dict(
        img_size=16, patch_size=4, stride=4, in_chans=3, num_classes=10,
        base_dims=[8, 8], head_list=[4, 8], depth_list=[2, 2],
        change_layer_list=[1, None], mlp_ratio=2.0,
        token_num_list=[16, 8],
        stage_list=[[0], [0], [0]],
        inter_layer_num=[[16, 8, 8]],     # (tokens before pool, pooled tokens, inter tokens)
        inter_layer_dim=[[32, 64]],       # (dim_old, dim_new = 2*dim_old)
    )
    key = jax.random.PRNGKey(0)
    pkey, xkey = jax.random.split(key)
    params = init_params(pkey, cfg)
    x = jax.random.normal(xkey, (2, cfg["in_chans"], cfg["img_size"], cfg["img_size"]),
                          jnp.float32)

    out = sufvit_forward(params, x, cfg)
    jax.block_until_ready(out)

    logits = out[0]
    assert logits.shape == (2, cfg["num_classes"])
    print("KERNEL_OK")
</pallas_src>

<mosaic_0001>
module attributes {stable_mosaic.version = 11 : i64} {
  func.func @_linear_kernel(%arg0: i32, %arg1: i32, %arg2: memref<32x48xf32, #tpu.memory_space<vmem>>, %arg3: memref<48x32xf32, #tpu.memory_space<vmem>>, %arg4: memref<1x32xf32, #tpu.memory_space<vmem>>, %arg5: memref<32x32xf32, #tpu.memory_space<vmem>>) attributes {dimension_semantics = [#tpu.dimension_semantics<parallel>, #tpu.dimension_semantics<parallel>], iteration_bounds = array<i64: 1, 1>, scalar_prefetch = 0 : i64, scratch_operands = 0 : i64, tpu.core_type = #tpu.core_type<tc>, window_params = [{transform_indices = @transform_0, window_bounds = array<i64: 32, 48>}, {transform_indices = @transform_1, window_bounds = array<i64: 48, 32>}, {transform_indices = @transform_2, window_bounds = array<i64: 1, 32>}, {transform_indices = @transform_3, window_bounds = array<i64: 32, 32>}]} {
    %c0 = arith.constant 0 : index
    %c0_0 = arith.constant 0 : index
    %0 = vector.load %arg2[%c0, %c0_0] : memref<32x48xf32, #tpu.memory_space<vmem>>, vector<32x48xf32>
    %c0_1 = arith.constant 0 : index
    %c0_2 = arith.constant 0 : index
    %1 = vector.load %arg3[%c0_1, %c0_2] : memref<48x32xf32, #tpu.memory_space<vmem>>, vector<48x32xf32>
    %2 = arith.truncf %0 : vector<32x48xf32> to vector<32x48xbf16>
    %3 = arith.truncf %1 : vector<48x32xf32> to vector<48x32xbf16>
    %cst = arith.constant dense<0.000000e+00> : vector<32x32xf32>
    %4 = tpu.matmul %2, %3, %cst {dimension_numbers = #tpu.dot_dimension_numbers<[1], [0], [0], [1], [0, 0, 1, 1], [], []>} : vector<32x48xbf16>, vector<48x32xbf16>, vector<32x32xf32> -> vector<32x32xf32>
    %c0_3 = arith.constant 0 : index
    %c0_4 = arith.constant 0 : index
    %5 = vector.load %arg4[%c0_3, %c0_4] : memref<1x32xf32, #tpu.memory_space<vmem>>, vector<1x32xf32>
    %6 = vector.broadcast %5 : vector<1x32xf32> to vector<32x32xf32>
    %7 = arith.addf %4, %6 : vector<32x32xf32>
    %c0_5 = arith.constant 0 : index
    %c0_6 = arith.constant 0 : index
    %8 = vector.load %arg5[%c0_5, %c0_6] : memref<32x32xf32, #tpu.memory_space<vmem>>, vector<32x32xf32>
    tpu.vector_store %arg5[%c0_5, %c0_6], %7 {strides = array<i32>} : memref<32x32xf32, #tpu.memory_space<vmem>>, vector<32x32xf32>,
    return
  }
  func.func @transform_0(%arg0: i32, %arg1: i32) -> (i32, i32) {
    %c0_i32 = arith.constant 0 : i32
    %c0_i32_0 = arith.constant 0 : i32
    return %arg0, %c0_i32 : i32, i32
  }
  func.func @transform_1(%arg0: i32, %arg1: i32) -> (i32, i32) {
    %c0_i32 = arith.constant 0 : i32
    %c0_i32_0 = arith.constant 0 : i32
    return %c0_i32, %arg1 : i32, i32
  }
  func.func @transform_2(%arg0: i32, %arg1: i32) -> (i32, i32) {
    %c0_i32 = arith.constant 0 : i32
    %c0_i32_0 = arith.constant 0 : i32
    return %c0_i32, %arg1 : i32, i32
  }
  func.func @transform_3(%arg0: i32, %arg1: i32) -> (i32, i32) {
    %c0_i32 = arith.constant 0 : i32
    return %arg0, %arg1 : i32, i32
  }
}

</mosaic_0001>

<bundles_post_ra>
// kernel: tpu_custom_call.1
= control target key start
LH: loop header
LB: loop body
LE: loop exit
PB: predicated region body
PF: predicated region fallthrough
CT: control target
= control target key end

     0   :  { %vm38_vm0 = vcmask 392192   ;;  %s228_s0 = inlined_call_operand.vmem [shape: f32[32,48], index: 0, kind: input, shape index: {}]   ;;  %s229_s1 = inlined_call_operand.vmem [shape: f32[48,32], index: 1, kind: input, shape index: {}]   ;;  %s230_s2 = inlined_call_operand.vmem [shape: f32[1,32], index: 2, kind: input, shape index: {}]   ;;  %s231_s3 = inlined_call_operand.hbm [shape: f32[32,32], index: 3, kind: output, shape index: {}]  }
   0x1   :  { %v20_v0 = vld [vmem:[%s229_s1] sm:$0xff]  ;;  %v21_v1 = vld [vmem:[%s229_s1 + $0x8] sm:$0xff]  ;;  %v22_v2 = vld [vmem:[%s229_s1 + $0x10] sm:$0xff] }
   0x2   :  { %v28_v3 = vpack.c.bf16 %v21_v1, %v20_v0  ;;  %v23_v4 = vld [vmem:[%s229_s1 + $0x18] sm:$0xff]  ;;  %v24_v5 = vld [vmem:[%s229_s1 + $0x20] sm:$0xff]  ;;  %v25_v7 = vld [vmem:[%s229_s1 + $0x28] sm:$0xff] }
   0x3   :  { %v29_v6 = vpack.c.bf16 %v23_v4, %v22_v2  ;;  %v16_v8 = vld [vmem:[%s228_s0] sm:$0xff]  ;;  %v17_v9 = vld [vmem:[%s228_s0 + $0x8] sm:$0xff] }
   0x4   :  { %123 = vmatprep.subr.bf16.mxu0 %v28_v3  ;;  %v26_v10 = vpack.c.bf16 %v17_v9, %v16_v8 }
   0x5   :  { %8 = vsyncpa [#allocation3], 0  ;;  %124 = vmatpush3.bf16.msra.mxu0 %v28_v3  ;;  %v30_v11 = vpack.c.bf16 %v25_v7, %v24_v5  ;;  %v18_v12 = vld [vmem:[%s228_s0 + $0x10] sm:$0xff]  ;;  %v19_v13 = vld [vmem:[%s228_s0 + $0x18] sm:$0xff]  ;;  %vm94_vm1 = vcmask 261120   ;;  %s160_s6 = smov [#allocation2]  }
   0x6   :  { %125 = vmatprep.subr.bf16.mxu0 %v29_v6  ;;  %129 = vmatprep.mubr.msk.bf16.mxu0 %vm38_vm0, %v26_v10  ;;  %v27_v14 = vpack.c.bf16 %v19_v13, %v18_v12  ;;  %v115_v15 = vld [vmem:[%s230_s2] ss:$0 sm:$0xff]  ;;  %s104_s7 = sshll.u32 %s160_s6, 4  ;;  %s105_s7 = int_to_ptr.vmem [resolvable:$true] %s104_s7 }
   0x7   :  { %s136_s0 = scalar_lea.vmem %s105_s7, 512  ;;  %p141_p1 = scmp.lt.s32.totalorder %s105_s7, %s105_s7 }
   0x8   :  { %p137_p0 = scmp.ne.s32.totalorder %s105_s7, %s136_s0  ;;  %p142_p2 = scmp.lt.s32.totalorder %s136_s0, %s136_s0 }
   0x9   :  { %126 = vmatpush3.bf16.msra.mxu0 %v29_v6 }
   0xa   :  { %127 = vmatprep.subr.bf16.mxu0 %v30_v11  ;;  %p143_p3 = por %p142_p2, %p141_p1 }
   0xc   :  { %p144_p4 = pnand %p143_p3, %p137_p0 }
   0xd   :  { %128 = vmatpush3.bf16.msra.mxu0 %v30_v11 }
  0x10   :  { %130 = vmatmul.mubr.msk.bf16.vlgmr.msra.gmra.mrb[0].mxu0 %vm38_vm0, %v27_v14 }
  0xe3   :  { %v131_v16 = vpop.f32.mrb[0].mxu0 }
  0xe4   :  { %v88_v17 = vadd.f32 %v131_v16, %v115_v15  ;;  %v79_v18 = vpop.f32.mrb[1].mxu0 }
  0xe5   :  { %v80_v19 = vadd.f32 %v115_v15, %v79_v18  ;;  %v132_v20 = vpop.f32.mrb[2].mxu0 }
  0xe6   :  { %97 = vst.msk [vmem:[#allocation2 + $0x10] sm:$0xff] %vm94_vm1, %v88_v17  ;;  %v91_v21 = vadd.f32 %v132_v20, %v115_v15  ;;  %v82_v22 = vpop.f32.mrb[3].mxu0 }
  0xe7   :  { %95 = vst.msk [vmem:[#allocation2] sm:$0xff] %vm94_vm1, %v80_v19  ;;  %v83_v23 = vadd.f32 %v115_v15, %v82_v22 }
  0xe8   :  { %98 = vst.msk [vmem:[#allocation2 + $0x18] sm:$0xff] %vm94_vm1, %v91_v21 }
  0xe9   :  { %96 = vst.msk [vmem:[#allocation2 + $0x8] sm:$0xff] %vm94_vm1, %v83_v23 }
  0xea   :  { %147 = shalt.err (!%p144_p4)
}
  0xeb   :  { %s148_s9 = scalar_lea.hbm %s231_s3, 512 }
  0xec   :  { %p149_p5 = scmp.ne.s32.totalorder %s231_s3, %s148_s9  ;;  %p152_p6 = scmp.lt.u32.totalorder %s148_s9, %s231_s3 }
  0xee   :  { %p154_p7 = pnand %p152_p6, %p149_p5 }
  0xf0   :  { %157 = shalt.err (!%p154_p7)
}
  0xf1   :  { %s161_s14 = smov 128   ;;  %s162_s15 = smov 8  }
  0xf2   :  { %110 = dma.vmem_to_hbm [thread:$0]  %s105_s7, 512, %s231_s3, [#allocation3], %s161_s14, %s161_s14, %s162_s15  }
  0xf3   :  { %158 = dma.done.wait [#allocation3], 512  }
  0xf4   :  { %159 = vsyncadd [#allocation3], 4294966784 }
  0xf5   :  { %114 = vsyncpa [#allocation3], 1 }

</bundles_post_ra>
